<compile_context>
chip_gen: v7x
topology: tpu7x:2x2x1
jax: 0.10.0
libtpu: 0.0.40
codegen_flags: <defaults>
</compile_context>

<pallas_src>
import functools
import math

import jax
import jax.numpy as jnp
from jax.experimental import pallas as pl
from jax.experimental.pallas import tpu as pltpu


def _flash_core_attention_kernel(*refs, scale, has_bias, has_mask, mxu_dtype):
    it = iter(refs)
    q_ref = next(it)                             # (1, 1, bq,  D)
    k_ref = next(it)                             # (1, 1, bkv, D)
    v_ref = next(it)                             # (1, 1, bkv, D)
    bias_ref = next(it) if has_bias else None    # (1, 1, bq, bkv)
    mask_ref = next(it) if has_mask else None    # (1, bq, bkv) int8
    o_ref = next(it)                             # (1, 1, bq,  D)
    m_sc = next(it)                              # (bq, 1) f32
    l_sc = next(it)                              # (bq, 1) f32
    acc_sc = next(it)                            # (bq, D) f32

    kv_idx = pl.program_id(3)

    @pl.when(kv_idx == 0)
    def _():
        m_sc[...] = jnp.full_like(m_sc, -jnp.inf)
        l_sc[...] = jnp.zeros_like(l_sc)
        acc_sc[...] = jnp.zeros_like(acc_sc)

    in_dtype = q_ref.dtype
    compute_dtype = in_dtype if mxu_dtype is None else mxu_dtype

    # PyTorch multiplies q by sqrt(D) (multiplied, not divided) in the input dtype
    # before the matmul — reproduced exactly, then cast for the MXU.
    q = (q_ref[0, 0] * jnp.asarray(scale, dtype=in_dtype)).astype(compute_dtype)
    k = k_ref[0, 0].astype(compute_dtype)
    v = v_ref[0, 0].astype(compute_dtype)

    # (bq, bkv) scores: contract D of both operands directly (no in-kernel transpose),
    # f32 accumulation on the MXU.
    s = jax.lax.dot_general(
        q, k,
        dimension_numbers=(((1,), (1,)), ((), ())),
        preferred_element_type=jnp.float32)

    if has_bias:
        s = s + bias_ref[0, 0].astype(jnp.float32)
    if has_mask:
        # torch masked_fill(mask, 0) happens BEFORE softmax, fill value 0 — reproduced.
        s = jnp.where(mask_ref[0] != 0, 0.0, s)

    # Online (flash) softmax update across the kv grid axis — all in f32.
    m_prev = m_sc[...]
    m_new = jnp.maximum(m_prev, jnp.max(s, axis=-1, keepdims=True))
    alpha = jnp.exp(m_prev - m_new)              # exp(-inf) = 0 on the first kv step
    p = jnp.exp(s - m_new)
    l_sc[...] = alpha * l_sc[...] + jnp.sum(p, axis=-1, keepdims=True)
    acc_sc[...] = alpha * acc_sc[...] + jnp.dot(
        p.astype(compute_dtype), v, preferred_element_type=jnp.float32)
    m_sc[...] = m_new

    @pl.when(kv_idx == pl.num_programs(3) - 1)
    def _():
        # Exact divide (not approx reciprocal) for closer parity with PyTorch.
        o_ref[0, 0] = (acc_sc[...] / l_sc[...]).astype(o_ref.dtype)


def _pick_block(size, cap):
    """Largest tile <= cap that divides `size` (prefer multiples of 8)."""
    if size <= cap:
        return size
    for b in range(cap, 0, -1):
        if size % b == 0 and b % 8 == 0:
            return b
    return size


def core_attention(q, k, v, attn_bias=None, mask=None, *,
                   block_q=256, block_kv=512, mxu_dtype=None):
    """q, k, v: (B, S, H, D). Returns (B, S, H*D), matching the PyTorch module."""
    B, S, H, D = q.shape
    scale = math.sqrt(D)
    has_bias = attn_bias is not None
    has_mask = mask is not None

    bq = _pick_block(S, block_q)
    bkv = _pick_block(S, block_kv)
    grid = (B, H, S // bq, S // bkv)

    # Head-major layout (B, H, S, D): each grid step DMAs one contiguous per-head tile.
    # (These are the same transposes the PyTorch module performs on its inputs.)
    qh = jnp.transpose(q, (0, 2, 1, 3))
    kh = jnp.transpose(k, (0, 2, 1, 3))
    vh = jnp.transpose(v, (0, 2, 1, 3))
    itemsize = jnp.dtype(q.dtype).itemsize

    in_specs = [
        pl.BlockSpec((1, 1, bq, D), lambda b, h, i, j: (b, h, i, 0)),
        pl.BlockSpec((1, 1, bkv, D), lambda b, h, i, j: (b, h, j, 0)),
        pl.BlockSpec((1, 1, bkv, D), lambda b, h, i, j: (b, h, j, 0)),
    ]
    args = [qh, kh, vh]
    bytes_accessed = 3 * B * H * S * D * itemsize
    bias_itemsize = 0

    if has_bias:
        bias = jnp.asarray(attn_bias)
        if bias.ndim == 3:
            # A 3-D bias is interpreted as (H, S, S) (broadcast over batch).
            if bias.shape not in ((H, S, S), (1, S, S)):
                raise ValueError(
                    f"3-D attn_bias must be (H, S, S) or (1, S, S); got {bias.shape}")
            bias = bias[None]
        if (bias.ndim != 4 or bias.shape[-2:] != (S, S)
                or bias.shape[0] not in (1, B) or bias.shape[1] not in (1, H)):
            raise ValueError(
                f"attn_bias shape {bias.shape} not broadcastable to {(B, H, S, S)}")
        bias_has_b = bias.shape[0] == B
        bias_has_h = bias.shape[1] == H

        # Broadcast dims are resolved in the index_map: same block index every step
        # => the pipeline re-uses the resident tile (no jnp.broadcast_to in HBM).
        def bias_map(b, h, i, j, _hb=bias_has_b, _hh=bias_has_h):
            return (b if _hb else 0, h if _hh else 0, i, j)

        in_specs.append(pl.BlockSpec((1, 1, bq, bkv), bias_map))
        args.append(bias)
        bias_itemsize = jnp.dtype(bias.dtype).itemsize
        bytes_accessed += bias.size * bias_itemsize

    if has_mask:
        mask_i8 = jnp.asarray(mask).astype(jnp.int8)   # 4x less DMA / VMEM than int32
        if mask_i8.shape != (B, S, S):
            raise ValueError(f"mask must have shape {(B, S, S)}; got {mask_i8.shape}")
        # index_map ignores the head axis -> resident tile reused across all H heads.
        in_specs.append(pl.BlockSpec((1, bq, bkv), lambda b, h, i, j: (b, i, j)))
        args.append(mask_i8)
        bytes_accessed += B * S * S

    bytes_accessed += B * H * S * D * itemsize   # output

    # Per-step VMEM footprint (double-buffered blocks + scratch + softmax temporaries);
    # cap at 64 MiB so the request is valid on v7x (which has half of v5e/v6e's VMEM).
    blk_bytes = 2 * ((bq * D + 2 * bkv * D + bq * D) * itemsize
                     + bq * bkv * bias_itemsize
                     + (bq * bkv if has_mask else 0))
    scratch_bytes = (2 * bq + bq * D) * 4
    temps_bytes = 4 * bq * bkv * 4
    vmem_limit = int(min(max(2 * (blk_bytes + scratch_bytes + temps_bytes), 32 * 2**20),
                         64 * 2**20))

    cost = pl.CostEstimate(
        flops=4 * B * H * S * S * D,
        transcendentals=B * H * S * S,
        bytes_accessed=int(bytes_accessed))

    kernel = functools.partial(
        _flash_core_attention_kernel,
        scale=scale, has_bias=has_bias, has_mask=has_mask, mxu_dtype=mxu_dtype)

    out = pl.pallas_call(
        kernel,
        out_shape=jax.ShapeDtypeStruct((B, H, S, D), q.dtype),
        grid_spec=pltpu.PrefetchScalarGridSpec(
            num_scalar_prefetch=0,
            grid=grid,
            in_specs=in_specs,
            out_specs=pl.BlockSpec((1, 1, bq, D), lambda b, h, i, j: (b, h, i, 0)),
            scratch_shapes=[
                pltpu.VMEM((bq, 1), jnp.float32),   # running max
                pltpu.VMEM((bq, 1), jnp.float32),   # running denom
                pltpu.VMEM((bq, D), jnp.float32),   # output accumulator
            ]),
        compiler_params=pltpu.CompilerParams(
            dimension_semantics=("parallel", "parallel", "parallel", "arbitrary"),
            vmem_limit_bytes=vmem_limit),
        cost_estimate=cost,
    )(*args)

    # (B, H, S, D) -> (B, S, H*D); mirrors x.transpose(1, 2).contiguous().view(...).
    return jnp.transpose(out, (0, 2, 1, 3)).reshape(B, S, H * D)


def _reference(q, k, v, attn_bias, mask, scale):
    # Pure-JAX reference mirroring the PyTorch forward, for validation.
    qt = jnp.transpose(q, (0, 2, 1, 3)) * scale          # (B, H, S, D)
    kt = jnp.transpose(k, (0, 2, 3, 1))                  # (B, H, D, S)
    vt = jnp.transpose(v, (0, 2, 1, 3))                  # (B, H, S, D)
    x = jnp.matmul(qt, kt, precision=jax.lax.Precision.HIGHEST)
    if attn_bias is not None:
        x = x + attn_bias
    if mask is not None:
        x = jnp.where(mask[:, None, :, :], 0.0, x)
    x = jax.nn.softmax(x, axis=3)
    x = jnp.matmul(x, vt, precision=jax.lax.Precision.HIGHEST)
    x = jnp.transpose(x, (0, 2, 1, 3))
    return x.reshape(q.shape[0], q.shape[1], -1)


if __name__ == "__main__":
    # Small shapes consistent with the module: hidden=32, num_heads=4 -> head dim 8.
    B, S, hidden, num_heads = 2, 8, 32, 4
    D = hidden // num_heads
    scale = math.sqrt(D)

    key = jax.random.PRNGKey(0)
    kq, kk, kvk, kb, km = jax.random.split(key, 5)
    q = jax.random.normal(kq, (B, S, num_heads, D), jnp.float32)
    k = jax.random.normal(kk, (B, S, num_heads, D), jnp.float32)
    v = jax.random.normal(kvk, (B, S, num_heads, D), jnp.float32)
    attn_bias = 0.1 * jax.random.normal(kb, (B, num_heads, S, S), jnp.float32)
    mask = jax.random.bernoulli(km, 0.2, (B, S, S))

    # Full path: bias + mask, exact f32 MXU path (strict parity).
    out = jax.block_until_ready(core_attention(q, k, v, attn_bias=attn_bias, mask=mask))
    ref = _reference(q, k, v, attn_bias, mask, scale)
    assert out.shape == (B, S, hidden)
    assert jnp.allclose(out, ref, atol=2e-2, rtol=2e-2), float(jnp.max(jnp.abs(out - ref)))

    # No-bias / no-mask fast path (no zero-bias materialization, no mask DMA).
    out2 = jax.block_until_ready(core_attention(q, k, v))
    ref2 = _reference(q, k, v, None, None, scale)
    assert jnp.allclose(out2, ref2, atol=2e-2, rtol=2e-2), float(jnp.max(jnp.abs(out2 - ref2)))

    # Head-broadcast bias (resolved in the index_map, not materialized) + optional
    # bf16 MXU path for f32 inputs (the v6e/v7x throughput option) at loose tolerance.
    bias_h = 0.1 * jax.random.normal(kb, (1, num_heads, S, S), jnp.float32)
    out3 = jax.block_until_ready(
        core_attention(q, k, v, attn_bias=bias_h, mask=mask, mxu_dtype=jnp.bfloat16))
    ref3 = _reference(q, k, v, bias_h, mask, scale)
    assert jnp.allclose(out3, ref3, atol=1e-1, rtol=1e-1), float(jnp.max(jnp.abs(out3 - ref3)))

    print("KERNEL_OK")
</pallas_src>

<mosaic_0001>
module attributes {stable_mosaic.version = 11 : i64} {
  func.func @_flash_core_attention_kernel(%arg0: i32, %arg1: i32, %arg2: i32, %arg3: i32, %arg4: memref<1x1x8x8xf32, #tpu.memory_space<vmem>>, %arg5: memref<1x1x8x8xf32, #tpu.memory_space<vmem>>, %arg6: memref<1x1x8x8xf32, #tpu.memory_space<vmem>>, %arg7: memref<1x1x8x8xf32, #tpu.memory_space<vmem>>, %arg8: memref<1x8x8xi8, #tpu.memory_space<vmem>>, %arg9: memref<1x1x8x8xf32, #tpu.memory_space<vmem>>, %arg10: memref<8x1xf32, #tpu.memory_space<vmem>>, %arg11: memref<8x1xf32, #tpu.memory_space<vmem>>, %arg12: memref<8x8xf32, #tpu.memory_space<vmem>>) attributes {dimension_semantics = [#tpu.dimension_semantics<parallel>, #tpu.dimension_semantics<parallel>, #tpu.dimension_semantics<parallel>, #tpu.dimension_semantics<arbitrary>], iteration_bounds = array<i64: 2, 4, 1, 1>, scalar_prefetch = 0 : i64, scratch_operands = 3 : i64, tpu.core_type = #tpu.core_type<tc>, window_params = [{transform_indices = @transform_0, window_bounds = array<i64: 1, 1, 8, 8>}, {transform_indices = @transform_1, window_bounds = array<i64: 1, 1, 8, 8>}, {transform_indices = @transform_2, window_bounds = array<i64: 1, 1, 8, 8>}, {transform_indices = @transform_3, window_bounds = array<i64: 1, 1, 8, 8>}, {transform_indices = @transform_4, window_bounds = array<i64: 1, 8, 8>}, {transform_indices = @transform_5, window_bounds = array<i64: 1, 1, 8, 8>}]} {
    %c0_i32 = arith.constant 0 : i32
    %0 = arith.cmpi eq, %arg3, %c0_i32 : i32
    %1 = arith.extui %0 : i1 to i32
    %c0_i32_0 = arith.constant 0 : i32
    %2 = arith.cmpi ne, %1, %c0_i32_0 : i32
    scf.if %2 {
      %cst_38 = arith.constant 0xFF800000 : f32
      %46 = vector.broadcast %cst_38 : f32 to vector<8x1xf32>
      %c0_39 = arith.constant 0 : index
      %c0_40 = arith.constant 0 : index
      %47 = vector.load %arg10[%c0_39, %c0_40] : memref<8x1xf32, #tpu.memory_space<vmem>>, vector<8x1xf32>
      tpu.vector_store %arg10[%c0_39, %c0_40], %46 {strides = array<i32>} : memref<8x1xf32, #tpu.memory_space<vmem>>, vector<8x1xf32>,
      %cst_41 = arith.constant 0.000000e+00 : f32
      %48 = vector.broadcast %cst_41 : f32 to vector<8x1xf32>
      %c0_42 = arith.constant 0 : index
      %c0_43 = arith.constant 0 : index
      %49 = vector.load %arg11[%c0_42, %c0_43] : memref<8x1xf32, #tpu.memory_space<vmem>>, vector<8x1xf32>
      tpu.vector_store %arg11[%c0_42, %c0_43], %48 {strides = array<i32>} : memref<8x1xf32, #tpu.memory_space<vmem>>, vector<8x1xf32>,
      %cst_44 = arith.constant 0.000000e+00 : f32
      %50 = vector.broadcast %cst_44 : f32 to vector<8x8xf32>
      %c0_45 = arith.constant 0 : index
      %c0_46 = arith.constant 0 : index
      %51 = vector.load %arg12[%c0_45, %c0_46] : memref<8x8xf32, #tpu.memory_space<vmem>>, vector<8x8xf32>
      tpu.vector_store %arg12[%c0_45, %c0_46], %50 {strides = array<i32>} : memref<8x8xf32, #tpu.memory_space<vmem>>, vector<8x8xf32>,
    } else {
    }
    %c0 = arith.constant 0 : index
    %c0_1 = arith.constant 0 : index
    %c0_2 = arith.constant 0 : index
    %c0_3 = arith.constant 0 : index
    %3 = vector.load %arg4[%c0, %c0_1, %c0_2, %c0_3] : memref<1x1x8x8xf32, #tpu.memory_space<vmem>>, vector<1x1x8x8xf32>
    %4 = vector.shape_cast %3 : vector<1x1x8x8xf32> to vector<8x8xf32>
    %cst = arith.constant 2.82842708 : f32
    %5 = vector.broadcast %cst : f32 to vector<8x8xf32>
    %6 = arith.mulf %4, %5 : vector<8x8xf32>
    %c0_4 = arith.constant 0 : index
    %c0_5 = arith.constant 0 : index
    %c0_6 = arith.constant 0 : index
    %c0_7 = arith.constant 0 : index
    %7 = vector.load %arg5[%c0_4, %c0_5, %c0_6, %c0_7] : memref<1x1x8x8xf32, #tpu.memory_space<vmem>>, vector<1x1x8x8xf32>
    %8 = vector.shape_cast %7 : vector<1x1x8x8xf32> to vector<8x8xf32>
    %c0_8 = arith.constant 0 : index
    %c0_9 = arith.constant 0 : index
    %c0_10 = arith.constant 0 : index
    %c0_11 = arith.constant 0 : index
    %9 = vector.load %arg6[%c0_8, %c0_9, %c0_10, %c0_11] : memref<1x1x8x8xf32, #tpu.memory_space<vmem>>, vector<1x1x8x8xf32>
    %10 = vector.shape_cast %9 : vector<1x1x8x8xf32> to vector<8x8xf32>
    %cst_12 = arith.constant dense<0.000000e+00> : vector<8x8xf32>
    %11 = tpu.matmul %6, %8, %cst_12 {dimension_numbers = #tpu.dot_dimension_numbers<[1], [1], [0], [0], [0, 0, 1, 0], [], []>} : vector<8x8xf32>, vector<8x8xf32>, vector<8x8xf32> -> vector<8x8xf32>
    %c0_13 = arith.constant 0 : index
    %c0_14 = arith.constant 0 : index
    %c0_15 = arith.constant 0 : index
    %c0_16 = arith.constant 0 : index
    %12 = vector.load %arg7[%c0_13, %c0_14, %c0_15, %c0_16] : memref<1x1x8x8xf32, #tpu.memory_space<vmem>>, vector<1x1x8x8xf32>
    %13 = vector.shape_cast %12 : vector<1x1x8x8xf32> to vector<8x8xf32>
    %14 = arith.addf %11, %13 : vector<8x8xf32>
    %c0_17 = arith.constant 0 : index
    %c0_18 = arith.constant 0 : index
    %c0_19 = arith.constant 0 : index
    %15 = vector.load %arg8[%c0_17, %c0_18, %c0_19] : memref<1x8x8xi8, #tpu.memory_space<vmem>>, vector<1x8x8xi8>
    %16 = vector.shape_cast %15 : vector<1x8x8xi8> to vector<8x8xi8>
    %c0_i8 = arith.constant 0 : i8
    %17 = vector.broadcast %c0_i8 : i8 to vector<8x8xi8>
    %18 = arith.cmpi ne, %16, %17 : vector<8x8xi8>
    %cst_20 = arith.constant 0.000000e+00 : f32
    %19 = vector.broadcast %cst_20 : f32 to vector<8x8xf32>
    %20 = arith.select %18, %19, %14 : vector<8x8xi1>, vector<8x8xf32>
    %c0_21 = arith.constant 0 : index
    %c0_22 = arith.constant 0 : index
    %21 = vector.load %arg10[%c0_21, %c0_22] : memref<8x1xf32, #tpu.memory_space<vmem>>, vector<8x1xf32>
    %cst_23 = arith.constant dense<0xFF800000> : vector<8xf32>
    %22 = vector.multi_reduction <maximumf>, %20, %cst_23 [1] : vector<8x8xf32> to vector<8xf32>
    %23 = vector.shape_cast %22 : vector<8xf32> to vector<8x1xf32>
    %24 = arith.maximumf %21, %23 : vector<8x1xf32>
    %25 = arith.subf %21, %24 : vector<8x1xf32>
    %26 = math.exp %25 : vector<8x1xf32>
    %27 = vector.broadcast %24 : vector<8x1xf32> to vector<8x8xf32>
    %28 = arith.subf %20, %27 : vector<8x8xf32>
    %29 = math.exp %28 : vector<8x8xf32>
    %c0_24 = arith.constant 0 : index
    %c0_25 = arith.constant 0 : index
    %30 = vector.load %arg11[%c0_24, %c0_25] : memref<8x1xf32, #tpu.memory_space<vmem>>, vector<8x1xf32>
    %31 = arith.mulf %26, %30 : vector<8x1xf32>
    %cst_26 = arith.constant dense<0.000000e+00> : vector<8xf32>
    %32 = vector.multi_reduction <add>, %29, %cst_26 [1] : vector<8x8xf32> to vector<8xf32>
    %33 = vector.shape_cast %32 : vector<8xf32> to vector<8x1xf32>
    %34 = arith.addf %31, %33 : vector<8x1xf32>
    %c0_27 = arith.constant 0 : index
    %c0_28 = arith.constant 0 : index
    %35 = vector.load %arg11[%c0_27, %c0_28] : memref<8x1xf32, #tpu.memory_space<vmem>>, vector<8x1xf32>
    tpu.vector_store %arg11[%c0_27, %c0_28], %34 {strides = array<i32>} : memref<8x1xf32, #tpu.memory_space<vmem>>, vector<8x1xf32>,
    %c0_29 = arith.constant 0 : index
    %c0_30 = arith.constant 0 : index
    %36 = vector.load %arg12[%c0_29, %c0_30] : memref<8x8xf32, #tpu.memory_space<vmem>>, vector<8x8xf32>
    %37 = vector.broadcast %26 : vector<8x1xf32> to vector<8x8xf32>
    %38 = arith.mulf %37, %36 : vector<8x8xf32>
    %cst_31 = arith.constant dense<0.000000e+00> : vector<8x8xf32>
    %39 = tpu.matmul %29, %10, %cst_31 {dimension_numbers = #tpu.dot_dimension_numbers<[1], [0], [0], [1], [0, 0, 1, 1], [], []>} : vector<8x8xf32>, vector<8x8xf32>, vector<8x8xf32> -> vector<8x8xf32>
    %40 = arith.addf %38, %39 : vector<8x8xf32>
    %c0_32 = arith.constant 0 : index
    %c0_33 = arith.constant 0 : index
    %41 = vector.load %arg12[%c0_32, %c0_33] : memref<8x8xf32, #tpu.memory_space<vmem>>, vector<8x8xf32>
    tpu.vector_store %arg12[%c0_32, %c0_33], %40 {strides = array<i32>} : memref<8x8xf32, #tpu.memory_space<vmem>>, vector<8x8xf32>,
    %c0_34 = arith.constant 0 : index
    %c0_35 = arith.constant 0 : index
    %42 = vector.load %arg10[%c0_34, %c0_35] : memref<8x1xf32, #tpu.memory_space<vmem>>, vector<8x1xf32>
    tpu.vector_store %arg10[%c0_34, %c0_35], %24 {strides = array<i32>} : memref<8x1xf32, #tpu.memory_space<vmem>>, vector<8x1xf32>,
    %c0_i32_36 = arith.constant 0 : i32
    %43 = arith.cmpi eq, %arg3, %c0_i32_36 : i32
    %44 = arith.extui %43 : i1 to i32
    %c0_i32_37 = arith.constant 0 : i32
    %45 = arith.cmpi ne, %44, %c0_i32_37 : i32
    scf.if %45 {
      %c0_38 = arith.constant 0 : index
      %c0_39 = arith.constant 0 : index
      %46 = vector.load %arg12[%c0_38, %c0_39] : memref<8x8xf32, #tpu.memory_space<vmem>>, vector<8x8xf32>
      %c0_40 = arith.constant 0 : index
      %c0_41 = arith.constant 0 : index
      %47 = vector.load %arg11[%c0_40, %c0_41] : memref<8x1xf32, #tpu.memory_space<vmem>>, vector<8x1xf32>
      %48 = vector.broadcast %47 : vector<8x1xf32> to vector<8x8xf32>
      %49 = arith.divf %46, %48 : vector<8x8xf32>
      %c0_42 = arith.constant 0 : index
      %c0_43 = arith.constant 0 : index
      %c0_44 = arith.constant 0 : index
      %c0_45 = arith.constant 0 : index
      %50 = vector.load %arg9[%c0_42, %c0_43, %c0_44, %c0_45] : memref<1x1x8x8xf32, #tpu.memory_space<vmem>>, vector<1x1x8x8xf32>
      %51 = vector.shape_cast %50 : vector<1x1x8x8xf32> to vector<8x8xf32>
      %52 = vector.shape_cast %49 : vector<8x8xf32> to vector<1x1x8x8xf32>
      tpu.vector_store %arg9[%c0_42, %c0_43, %c0_44, %c0_45], %52 {strides = array<i32>} : memref<1x1x8x8xf32, #tpu.memory_space<vmem>>, vector<1x1x8x8xf32>,
    } else {
    }
    return
  }
  func.func @transform_0(%arg0: i32, %arg1: i32, %arg2: i32, %arg3: i32) -> (i32, i32, i32, i32) {
    %c0_i32 = arith.constant 0 : i32
    %c0_i32_0 = arith.constant 0 : i32
    return %arg0, %arg1, %arg2, %c0_i32 : i32, i32, i32, i32
  }
  func.func @transform_1(%arg0: i32, %arg1: i32, %arg2: i32, %arg3: i32) -> (i32, i32, i32, i32) {
    %c0_i32 = arith.constant 0 : i32
    %c0_i32_0 = arith.constant 0 : i32
    return %arg0, %arg1, %arg3, %c0_i32 : i32, i32, i32, i32
  }
  func.func @transform_2(%arg0: i32, %arg1: i32, %arg2: i32, %arg3: i32) -> (i32, i32, i32, i32) {
    %c0_i32 = arith.constant 0 : i32
    %c0_i32_0 = arith.constant 0 : i32
    return %arg0, %arg1, %arg3, %c0_i32 : i32, i32, i32, i32
  }
  func.func @transform_3(%arg0: i32, %arg1: i32, %arg2: i32, %arg3: i32) -> (i32, i32, i32, i32) {
    %c0_i32 = arith.constant 0 : i32
    return %arg0, %arg1, %arg2, %arg3 : i32, i32, i32, i32
  }
  func.func @transform_4(%arg0: i32, %arg1: i32, %arg2: i32, %arg3: i32) -> (i32, i32, i32) {
    %c0_i32 = arith.constant 0 : i32
    return %arg0, %arg2, %arg3 : i32, i32, i32
  }
  func.func @transform_5(%arg0: i32, %arg1: i32, %arg2: i32, %arg3: i32) -> (i32, i32, i32, i32) {
    %c0_i32 = arith.constant 0 : i32
    %c0_i32_0 = arith.constant 0 : i32
    return %arg0, %arg1, %arg2, %c0_i32 : i32, i32, i32, i32
  }
}

</mosaic_0001>

<bundles_post_ra>
// kernel: tpu_custom_call.1
= control target key start
LH: loop header
LB: loop body
LE: loop exit
PB: predicated region body
PF: predicated region fallthrough
CT: control target
= control target key end

     0   :  { %s1626_s0 = inlined_call_operand.hbm [shape: f32[2,4,8,8], index: 0, kind: input, shape index: {}]   ;;  %s1627_s1 = inlined_call_operand.hbm [shape: f32[2,4,8,8], index: 1, kind: input, shape index: {}]   ;;  %s1628_s2 = inlined_call_operand.hbm [shape: f32[2,4,8,8], index: 2, kind: input, shape index: {}]   ;;  %s1629_s3 = inlined_call_operand.hbm [shape: f32[2,4,8,8], index: 3, kind: input, shape index: {}]   ;;  %s1630_s4 = inlined_call_operand.vmem [shape: s8[2,8,8], index: 4, kind: input, shape index: {}]   ;;  %s1631_s5 = inlined_call_operand.hbm [shape: f32[2,4,8,8], index: 5, kind: output, shape index: {}]  }
   0x1   :  { %1645 = sst [smem:[#allocation27_spill]] %s1627_s1 }
   0x2   :  { %10 = vsyncpa [#allocation6], 0 }
   0x3   :  { %12 = vsyncpa [#allocation6 + $0x1], 0 }
   0x4   :  { %13 = vsyncpa [#allocation9], 0 }
   0x5   :  { %15 = vsyncpa [#allocation9 + $0x1], 0 }
   0x6   :  { %16 = vsyncpa [#allocation12], 0 }
   0x7   :  { %18 = vsyncpa [#allocation12 + $0x1], 0 }
   0x8   :  { %19 = vsyncpa [#allocation7], 0 }
   0x9   :  { %21 = vsyncpa [#allocation7 + $0x1], 0  ;;  %s1288_s18 = smov 0   ;;  %s1290_s19 = smov 0  }
   0xa   :  { %s1292_s20 = smov 0   ;;  %s1294_s21 = smov 0  }
   0xb   :  { %s1296_s22 = smov 0   ;;  %s1298_s23 = smov 0  }
   0xc   :  { %s1300_s24 = smov 0   ;;  %s1302_s25 = smov 0  }
   0xd LB: > { %1646 = sst [smem:[#allocation18_spill]] %s1219_s18  ;;  %s1329_s26 = sadd.s32 4294967295, %s1247_s25   ;;  %s1247_s25 = sphi %s1302_s25, %s27_s25   ;;  %s1243_s24 = sphi %s1300_s24, %s1679_s24   ;;  %s1239_s23 = sphi %s1298_s23, %s1682_s23   ;;  %s1235_s22 = sphi %s1296_s22, %s1677_s22   ;;  %s1231_s21 = sphi %s1294_s21, %s1676_s21   ;;  %s1227_s20 = sphi %s1292_s20, %s1675_s20   ;;  %s1223_s19 = sphi %s1290_s19, %s1681_s19   ;;  %s1219_s18 = sphi %s1288_s18, %s1680_s18  }
   0xe   : > { %1647 = sst [smem:[#allocation19_spill]] %s1227_s20  ;;  %s872_s27 = sadd.s32 4294967294, %s1247_s25  }
   0xf   : > { %1648 = sst [smem:[#allocation20_spill]] %s1239_s23  ;;  %s49_s28 = sadd.s32 1, %s1239_s23 }
  0x10   : > { %1649 = sst [smem:[#allocation21_spill]] %s1243_s24  ;;  %s53_s29 = sadd.s32 1, %s1243_s24 }
  0x11   : > { %1650 = sst [smem:[#allocation22_spill]] %s1247_s25  ;;  %p51_p0 = scmp.ge.s32.totalorder %s49_s28, 4 }
  0x12   : > { %s64_s30 = sadd.s32 1, %s1227_s20  ;;  %p71_p1 = scmp.ne.s32.totalorder %s1227_s20, %s1223_s19 }
  0x13   : > { %p72_p2 = scmp.eq.s32.totalorder %s1247_s25, 0  ;;  %s1684_s28 = smov (%p51_p0, %s49_s28), 0 }
  0x14   : > { %1651 = sst [smem:[#allocation23_spill]] %s1684_s28  ;;  %s1686_s29 = smov (!%p51_p0, %s53_s29), %s1243_s24 }
  0x15   : > { %s58_s6 = ssub.s32 %s1239_s23, %s1684_s28  ;;  %p1343_p3 = por %p72_p2, %p71_p1 }
  0x16   : > { %p55_p4 = scmp.ge.s32.totalorder %s1686_s29, 2  ;;  %p77_p5 = scmp.ne.s32.totalorder %s1223_s19, %s1219_s18 }
  0x17   : > { %p78_p6 = scmp.eq.s32.totalorder %s1329_s26, 0  ;;  %p227_p7 = scmp.eq.s32.totalorder %s1329_s26, 7 }
  0x18   : > { %s1688_s29 = smov (%p55_p4, %s1686_s29), 0  ;;  %p233_p10 = scmp.eq.s32.totalorder %s872_s27, 7 }
  0x19   : > { %1653 = sst [smem:[#allocation24_spill]] %s1688_s29  ;;  %p1353_p8 = por %p78_p6, %p77_p5 }
  0x1a   : > { %p1357_p9 = por %p227_p7, %p71_p1  ;;  %s57_s10 = ssub.s32 %s1243_s24, %s1688_s29 }
  0x1b   : > { %s1654_s8 = scalar_select %p1353_p8, 1, 0 }
  0x1c   : > { %s1655_s9 = scalar_select %p1357_p9, 1, 0 }
  0x1d   : > { %s59_s11 = sor.u32 %s58_s6, %s57_s10  ;;  %p1363_p12 = por %p233_p10, %p77_p5 }
  0x1e   : > { %p62_p11 = scmp.eq.s32.totalorder %s59_s11, 0  ;;  %p943_p13 = scmp.lt.s32.totalorder %s1247_s25, 8 }
  0x1f   : > { %s1656_s12 = scalar_select %p1363_p12, 1, 0 }
  0x20   : > { %s1369_s13 = sand.u32 1, %s1227_s20   ;;  %s876_s16 = sshll.u32 %s1243_s24, 2 }
  0x21   : > { %1657 = sst [smem:[#allocation25_spill]] %s1656_s12  ;;  %s1375_s15 = sshll.u32 %s1369_s13, 3 }
  0x22   : > { %s1372_s14 = scalar_select %p62_p11, %s1227_s20, %s64_s30  }
  0x23   : > { %s263_s17 = sadd.s32 %s1239_s23, %s876_s16  ;;  %p1381_p0 = pnand %p943_p13, %p1343_p3 }
  0x24   : > { %1658 = sst [smem:[#allocation26_spill]] %s1372_s14  ;;  %s1385_s6 = sshll.u32 %s263_s17, 7 }
  0x25   : > { %s1659_s27 = scalar_select %p1381_p0, 1, 0 }
  0x26   : > { %s274_s10 = sand.u32 1, %s1247_s25   ;;  %s1660_s1 = sld [smem:[#allocation27_spill]] }
  0x27   : > { %s278_s16 = scalar_lea.vmem [#allocation8], %s1375_s15  ;;  %s1399_s28 = scalar_lea.sflag [#allocation9], %s274_s10 }
  0x28   : > { %s288_s7 = sshll.u32 %s278_s16, 4  ;;  %p1405_p4 = pneg %p1381_p0  ;;  %s1396_s7 = int_to_ptr.vmem [resolvable:$true] %s288_s7 }
  0x2c   : > { %s1392_s30 = scalar_lea.hbm %s1660_s1, %s1385_s6  ;;  %s1026_s16 = scalar_lea.hbm %s1660_s1, 1024 }
  0x2d   : > { %s1021_s17 = scalar_lea.hbm %s1392_s30, 128  ;;  %p1027_p7 = scmp.lt.u32.totalorder %s1392_s30, %s1660_s1 }
  0x2e   : > { %p1022_p3 = scmp.ne.s32.totalorder %s1392_s30, %s1021_s17  ;;  %p1028_p10 = scmp.lt.u32.totalorder %s1026_s16, %s1021_s17 }
  0x2f   : > { %p1030_p13 = scmp.lt.u32.totalorder %s1021_s17, %s1392_s30 }
  0x30   : > { %p1024_p5 = pnand %p1405_p4, %p1022_p3  ;;  %p1029_p11 = por %p1028_p10, %p1027_p7 }
  0x32   : > { %p1025_p6 = pneg %p1024_p5  ;;  %p1031_p1 = por %p1030_p13, %p1029_p11 }
  0x34   : > { %p1032_p2 = pnand %p1031_p1, %p1025_p6 }
  0x36   : > { %1035 = shalt.err (!%p1032_p2)
}
  0x37   : > { %s1036_s10 = scalar_lea.vmem %s1396_s7, 128  ;;  %s1249_s29 = smov [#allocation8]  }
  0x38   : > { %p1037_p3 = scmp.ne.s32.totalorder %s1396_s7, %s1036_s10  ;;  %s1041_s11 = sshll.u32 %s1249_s29, 4  ;;  %s1042_s11 = int_to_ptr.vmem [resolvable:$false] %s1041_s11 }
  0x39   : > { %s1043_s23 = scalar_lea.vmem %s1042_s11, 256  ;;  %p1044_p9 = scmp.lt.s32.totalorder %s1396_s7, %s1042_s11 }
  0x3a   : > { %p1039_p5 = pnand %p1037_p3, %p1405_p4  ;;  %p1045_p8 = scmp.lt.s32.totalorder %s1043_s23, %s1036_s10 }
  0x3c   : > { %p1040_p12 = pneg %p1039_p5  ;;  %p1046_p7 = por %p1045_p8, %p1044_p9 }
  0x3e   : > { %p1047_p10 = pnand %p1046_p7, %p1040_p12 }
  0x40   : > { %1050 = shalt.err (!%p1047_p10)
}
  0x41   : > { %932 = dma.hbm_to_vmem [thread:$0]  (!%p1381_p0), %s1392_s30, 128, %s1396_s7, %s1399_s28  }
  0x42   : > { %p1662_p1 = scmp.lt.s32.totalorder %s1247_s25, 9  ;;  %p1663_p2 = scmp.ge.s32.totalorder %s1247_s25, 1 }
  0x43   : > { %s1441_s10 = scalar_lea.hbm %s1626_s0, %s1385_s6  ;;  %s257_s29 = scalar_lea.vmem [#allocation5], %s1375_s15 }
  0x44   : > { %p1433_p6 = pnand %p1663_p2, %p1662_p1  ;;  %s267_s11 = sshll.u32 %s257_s29, 4  ;;  %s1444_s11 = int_to_ptr.vmem [resolvable:$true] %s267_s11 }
  0x45   : > { %s1450_s23 = scalar_lea.hbm %s1628_s2, %s1385_s6  ;;  %s254_s1 = scalar_lea.sflag [#allocation6], %s1369_s13 }
  0x46   : > { %s1664_s14 = scalar_select %p1433_p6, 1, 0 }
  0x47   : > { %s1051_s20 = scalar_lea.hbm %s1441_s10, 128  ;;  %s1056_s12 = scalar_lea.hbm %s1626_s0, 1024 }
  0x48   : > { %p1052_p8 = scmp.ne.s32.totalorder %s1441_s10, %s1051_s20  ;;  %p1057_p11 = scmp.lt.u32.totalorder %s1441_s10, %s1626_s0 }
  0x49   : > { %p1058_p13 = scmp.lt.u32.totalorder %s1056_s12, %s1051_s20  ;;  %p1060_p5 = scmp.lt.u32.totalorder %s1051_s20, %s1441_s10 }
  0x4a   : > { %p1054_p9 = pnand %p1052_p8, %p1405_p4 }
  0x4b   : > { %p1059_p3 = por %p1058_p13, %p1057_p11 }
  0x4c   : > { %p1055_p12 = pneg %p1054_p9 }
  0x4d   : > { %p1061_p7 = por %p1060_p5, %p1059_p3 }
  0x4f   : > { %p1062_p10 = pnand %p1061_p7, %p1055_p12 }
  0x51   : > { %1065 = shalt.err (!%p1062_p10)
}
  0x52   : > { %s1066_s29 = scalar_lea.vmem %s1444_s11, 128  ;;  %s1250_s30 = smov [#allocation5]  }
  0x53   : > { %p1067_p1 = scmp.ne.s32.totalorder %s1444_s11, %s1066_s29  ;;  %s1071_s7 = sshll.u32 %s1250_s30, 4  ;;  %s1072_s7 = int_to_ptr.vmem [resolvable:$false] %s1071_s7 }
  0x54   : > { %s1073_s18 = scalar_lea.vmem %s1072_s7, 256  ;;  %p1074_p9 = scmp.lt.s32.totalorder %s1444_s11, %s1072_s7 }
  0x55   : > { %p1069_p2 = pnand %p1067_p1, %p1405_p4  ;;  %p1075_p6 = scmp.lt.s32.totalorder %s1073_s18, %s1066_s29 }
  0x57   : > { %p1070_p8 = pneg %p1069_p2  ;;  %p1076_p11 = por %p1075_p6, %p1074_p9 }
  0x59   : > { %p1077_p13 = pnand %p1076_p11, %p1070_p8 }
  0x5b   : > { %1080 = shalt.err (!%p1077_p13)
}
  0x5c   : > { %929 = dma.hbm_to_vmem [thread:$0]  (!%p1381_p0), %s1441_s10, 128, %s1444_s11, %s254_s1  }
  0x5d   : > { %s299_s20 = scalar_lea.vmem [#allocation10], %s1375_s15  ;;  %s1081_s12 = scalar_lea.hbm %s1450_s23, 128 }
  0x5e   : > { %s309_s25 = sshll.u32 %s299_s20, 4  ;;  %p1082_p12 = scmp.ne.s32.totalorder %s1450_s23, %s1081_s12  ;;  %s310_s25 = int_to_ptr.vmem [resolvable:$true] %s309_s25 }
  0x5f   : > { %s1086_s29 = scalar_lea.hbm %s1628_s2, 1024  ;;  %p1087_p5 = scmp.lt.u32.totalorder %s1450_s23, %s1628_s2 }
  0x60   : > { %p1084_p6 = pnand %p1082_p12, %p1405_p4  ;;  %p1088_p7 = scmp.lt.u32.totalorder %s1086_s29, %s1081_s12 }
  0x61   : > { %p1090_p1 = scmp.lt.u32.totalorder %s1081_s12, %s1450_s23 }
  0x62   : > { %p1085_p3 = pneg %p1084_p6  ;;  %p1089_p10 = por %p1088_p7, %p1087_p5 }
  0x64   : > { %p1091_p2 = por %p1090_p1, %p1089_p10 }
  0x66   : > { %p1092_p8 = pnand %p1091_p2, %p1085_p3 }
  0x68   : > { %1095 = shalt.err (!%p1092_p8)
}
  0x69   : > { %s1096_s1 = scalar_lea.vmem %s310_s25, 128  ;;  %s1251_s10 = smov [#allocation10]  }
  0x6a   : > { %p1097_p9 = scmp.ne.s32.totalorder %s310_s25, %s1096_s1  ;;  %s1101_s11 = sshll.u32 %s1251_s10, 4  ;;  %s1102_s11 = int_to_ptr.vmem [resolvable:$false] %s1101_s11 }
  0x6b   : > { %s1103_s18 = scalar_lea.vmem %s1102_s11, 256  ;;  %p1104_p12 = scmp.lt.s32.totalorder %s310_s25, %s1102_s11 }
  0x6c   : > { %p1099_p11 = pnand %p1097_p9, %p1405_p4  ;;  %p1105_p6 = scmp.lt.s32.totalorder %s1103_s18, %s1096_s1 }
  0x6e   : > { %p1100_p13 = pneg %p1099_p11  ;;  %p1106_p0 = por %p1105_p6, %p1104_p12 }
  0x70   : > { %p1107_p5 = pnand %p1106_p0, %p1100_p13 }
  0x72   : > { %1110 = shalt.err (!%p1107_p5)
}
  0x73   : > { %p1665_p7 = scmp.ne.s32.totalorder %s1659_s27, 0  ;;  %s1497_s17 = scalar_lea.hbm %s1629_s3, %s1385_s6 }
  0x74   : > { %s320_s16 = scalar_lea.vmem [#allocation11], %s1375_s15  ;;  %s317_s30 = scalar_lea.sflag [#allocation12], %s1369_s13 }
  0x75   : > { %935 = dma.hbm_to_vmem [thread:$0]  (!%p1665_p7), %s1450_s23, 128, %s310_s25, %s1399_s28  }
  0x76   : > { %s331_s29 = sshll.u32 %s320_s16, 4  ;;  %s1111_s7 = scalar_lea.hbm %s1497_s17, 128  ;;  %s332_s29 = int_to_ptr.vmem [resolvable:$true] %s331_s29 }
  0x77   : > { %p1112_p0 = scmp.ne.s32.totalorder %s1497_s17, %s1111_s7  ;;  %s1116_s23 = scalar_lea.hbm %s1629_s3, 1024 }
  0x78   : > { %p1117_p1 = scmp.lt.u32.totalorder %s1497_s17, %s1629_s3  ;;  %p1118_p2 = scmp.lt.u32.totalorder %s1116_s23, %s1111_s7 }
  0x79   : > { %p1114_p3 = pnand %p1112_p0, %p1405_p4  ;;  %p1120_p9 = scmp.lt.u32.totalorder %s1111_s7, %s1497_s17 }
  0x7a   : > { %p1119_p8 = por %p1118_p2, %p1117_p1 }
  0x7b   : > { %p1115_p10 = pneg %p1114_p3 }
  0x7c   : > { %p1121_p11 = por %p1120_p9, %p1119_p8 }
  0x7e   : > { %p1122_p13 = pnand %p1121_p11, %p1115_p10 }
  0x80   : > { %1125 = shalt.err (!%p1122_p13)
}
  0x81   : > { %s1126_s13 = scalar_lea.vmem %s332_s29, 128  ;;  %s1252_s15 = smov [#allocation11]  }
  0x82   : > { %p1127_p12 = scmp.ne.s32.totalorder %s332_s29, %s1126_s13  ;;  %s1131_s10 = sshll.u32 %s1252_s15, 4  ;;  %s1132_s10 = int_to_ptr.vmem [resolvable:$false] %s1131_s10 }
  0x83   : > { %s1133_s11 = scalar_lea.vmem %s1132_s10, 256  ;;  %p1134_p0 = scmp.lt.s32.totalorder %s332_s29, %s1132_s10 }
  0x84   : > { %p1129_p6 = pnand %p1127_p12, %p1405_p4  ;;  %p1135_p3 = scmp.lt.s32.totalorder %s1133_s11, %s1126_s13 }
  0x86   : > { %p1130_p5 = pneg %p1129_p6  ;;  %p1136_p7 = por %p1135_p3, %p1134_p0 }
  0x88   : > { %p1137_p1 = pnand %p1136_p7, %p1130_p5 }
  0x8a   : > { %1140 = shalt.err (!%p1137_p1)
}
  0x8b   : > { %p1666_p2 = scmp.ne.s32.totalorder %s1659_s27, 0  ;;  %p1667_p10 = scmp.ne.s32.totalorder %s1664_s14, 0 }
  0x8c   : > { %s1521_s24 = sand.u32 (!%p1667_p10), 1, %s1223_s19   ;;  %p1668_p4 = scmp.ne.s32.totalorder (!%p1667_p10), %s1654_s8, 0 }
  0x8d   : > { %938 = dma.hbm_to_vmem [thread:$0]  (!%p1666_p2), %s1497_s17, 128, %s332_s29, %s317_s30  }
  0x8e   : > { %353 = sbr.rel (%p1667_p10) target bundleno = 973 (0x3cd), region = 40  ;;  %s1524_s18 = sshll.u32 (!%p1667_p10), %s1521_s24, 3 }
  0x8f   : > { %s356_s20 = scalar_lea.sflag (!%p1667_p10), [#allocation6], %s1521_s24  ;;  %s359_s12 = scalar_lea.vmem (!%p1667_p10), [#allocation5], %s1524_s18 }
  0x95   : > { %1202 = dma.done.wait (%p1668_p4), %s356_s20, 128  }
  0x96   : > { %1204 = vsyncadd (%p1668_p4), %s356_s20, 4294967168  ;;  %s364_s27 = sand.u32 1, %s1329_s26   ;;  %s368_s17 = scalar_lea.vmem [#allocation8], %s1524_s18 }
  0x97   : > { %s365_s14 = scalar_lea.sflag [#allocation9], %s364_s27 }
  0x98   : > { %1206 = dma.done.wait (%p1668_p4), %s365_s14, 256  }
  0x99   : > { %1208 = vsyncadd (%p1668_p4), %s365_s14, 4294967040  ;;  %s377_s16 = scalar_lea.vmem [#allocation10], %s1524_s18  ;;  %s383_s29 = scalar_lea.sflag [#allocation12], %s1521_s24 }
  0x9a   : > { %s386_s30 = scalar_lea.vmem [#allocation11], %s1524_s18 }
  0x9b   : > { %1210 = dma.done.wait (%p1668_p4), %s383_s29, 128  }
  0x9c   : > { %1212 = vsyncadd (%p1668_p4), %s383_s29, 4294967168  ;;  %vm457_vm0 = vcmask 64512   ;;  %v1253_v0 = vmov 0.0   ;;  %vm1254_vm1 = vmmov 0   ;;  %v461_v1 = vld [vmem:[%s368_s17] sm:$0xff]  ;;  %v459_v2 = vld [vmem:[%s359_s12] sm:$0xff] }
  0x9d   : > { %906 = vmatprep.subr.mxu0 %v1253_v0  ;;  %458 = vst.msk [vmem:[#allocation4] sm:$0xff] %vm457_vm0, %v1253_v0  ;;  %908 = vmatprep.mubr.msk.f32.mxu0 %vm1254_vm1, %v1253_v0  ;;  %v460_v3 = vmul.f32 2.828427, %v459_v2  ;;  %v1255_v4 = vmov 0   ;;  %vm454_vm2 = vcmask 7168   ;;  %v1256_v5 = vmov -inf  }
  0x9e   : > { %911 = vmatprep.subr.mxu1 %v1253_v0  ;;  %913 = vmatprep.mubr.msk.f32.mxu1 %vm1254_vm1, %v1253_v0  ;;  %455 = vst.msk [vmem:[#allocation2] sm:$0xff] %vm454_vm2, %v1256_v5  ;;  %456 = vst.msk [vmem:[#allocation3] sm:$0xff] %vm454_vm2, %v1253_v0  ;;  %p438_p7 = scmp.lt.s32.totalorder %s1235_s22, 1  ;;  %v463_v9 = vld [vmem:[%s386_s30] sm:$0xff]  ;;  %v462_v19 = vld [vmem:[%s377_s16] sm:$0xff]  ;;  %s898_s23 = sshll.u32 %s1235_s22, 2 }
  0x9f   : > { %907 = vmatpush3.xpose.msk.msra.mxu0 %vm457_vm0, %v461_v1  ;;  %1013 = vset.pattern.permute.xlu0 %v1255_v4  ;;  %s680_s25 = sadd.s32 %s1231_s21, %s898_s23  ;;  %s437_s13 = scalar_lea.vmem [#allocation13], %s1524_s18 }
  0xa0   : > { %1014 = vset.pattern.permute.xlu1 %v1255_v4  ;;  %s439_s26 = scalar_select %p438_p7, %s1235_s22, 1  ;;  %912 = vmatpush3.msra.mxu1 %v462_v19 }
  0xa1   : > { %s899_s6 = sshll.u32 %s680_s25, 7  ;;  %s684_s15 = sshll.u32 %s437_s13, 4  ;;  %s1573_s15 = int_to_ptr.vmem [resolvable:$true] %s684_s15 }
  0xa2   : > { %909 = vmatmul.mubr.msk.f32.vlgmr.msra.gmra.mrb[0].mxu0 %vm457_vm0, %v460_v3  ;;  %s893_s8 = sshll.u32 %s439_s26, 1  ;;  %s1571_s20 = scalar_lea.hbm %s1631_s5, %s899_s6 }
  0xa3   : > { %s447_s28 = scalar_lea.vmem %s1630_s4, %s893_s8  ;;  %s668_s22 = scalar_lea.sflag [#allocation7], %s1521_s24 }
  0xa4   : > { %v541_v6 = vld [vmem:[%s447_s28] sm:$0x3]  ;;  %v571_v32 = vld [vmem:[#allocation4] sm:$0xff]  ;;  %s1141_s21 = scalar_lea.vmem %s1573_s15, 128  ;;  %p1669_p9 = scmp.ne.s32.totalorder %s1655_s9, 0 }
  0xa5   : > { %vm542_vm3 = vnez %v541_v6  ;;  %v547_v15 = vld [vmem:[#allocation2] sm:$0xff]  ;;  %v563_v27 = vld [vmem:[#allocation3] sm:$0xff]  ;;  %p1142_p8 = scmp.ne.s32.totalorder %s1573_s15, %s1141_s21  ;;  %s1257_s18 = smov [#allocation13]  }
  0xa6   : > { %v543_v7 = vsel %vm542_vm3, 16843009, %v1255_v4  ;;  %s1145_s12 = sshll.u32 %s1257_s18, 4  ;;  %s1146_s12 = int_to_ptr.vmem [resolvable:$false] %s1145_s12 }
  0xa7   : > { %v544_v8 = vunpack.c.0.s8 %v543_v7  ;;  %p1143_p11 = pnand %p1142_p8, %p1669_p9  ;;  %s1147_s27 = scalar_lea.vmem %s1146_s12, 256 }
  0xa8   : > { %p1148_p12 = scmp.lt.s32.totalorder %s1573_s15, %s1146_s12  ;;  %p1149_p6 = scmp.lt.s32.totalorder %s1147_s27, %s1141_s21 }
  0xa9   : > { %vm545_vm4 = vcmp.ne.s32.totalorder %v544_v8, 0  ;;  %p1144_p13 = pneg %p1143_p11 }
  0xaa   : > { %p1150_p5 = por %p1149_p6, %p1148_p12 }
  0xac   : > { %p1151_p0 = pnand %p1150_p5, %p1144_p13 }
 0x175   : > { %v537_v10 = vpop.f32.mrb[0].mxu0 }
 0x176   : > { %v538_v11 = vadd.f32 %v537_v10, %v463_v9  ;;  %v910_v12 = vpop.f32.mrb[1].mxu0 }
 0x178   : > { %v546_v13 = vsel %vm545_vm4, 0.0, %v538_v11 }
 0x179   : > { %v548_v14 = vsel %vm457_vm0, %v546_v13, -inf }
 0x17a   : > { %549 = vmax.xlane.f32.xlu0 %v548_v14 }
 0x207   : > { %v550_v16 = vpop.xlane.xlu0 %549 }
 0x208   : > { %v551_v17 = vmax.f32 %v547_v15, %v550_v16 }
 0x20a   : > { %v552_v18 = vsub.f32 %v547_v15, %v551_v17  ;;  %653 = vst.msk [vmem:[#allocation2] sm:$0xff] %vm454_vm2, %v551_v17  ;;  %557 = vperm.xlu0 %1013, %v551_v17  }
 0x20c   : > { %v553_v25 = vmul.f32 1.442695, %v552_v18 }
 0x289   : > { %v558_v20 = vpop.permute.xlu0 %557 }
 0x28a   : > { %v560_v21 = vsub.f32 %v546_v13, %v558_v20 }
 0x28c   : > { %v561_v22 = vmul.f32 1.442695, %v560_v21 }
 0x28e   : > { %1015 = vpow2.f32 %v561_v22 }
 0x28f   : > { %1017 = vpow2.f32 %v553_v25 }
 0x298   : > { %v1016_v23 = vpop.eup %1015 }
 0x299   : > { %914 = vmatmul.mubr.msk.f32.vlgmr.msra.gmra.mrb[0].mxu1 %vm457_vm0, %v1016_v23  ;;  %v565_v24 = vsel %vm457_vm0, %v1016_v23, 0.0  ;;  %v1018_v26 = vpop.eup %1017 }
 0x29a   : > { %566 = vadd.xlane.f32.xlu1 %v565_v24  ;;  %v564_v28 = vmul.f32 %v1018_v26, %v563_v27 }
 0x2ab   : > { %574 = vperm.xlu1 %1014, %v1018_v26  }
 0x327   : > { %v567_v29 = vpop.xlane.xlu1 %566 }
 0x328   : > { %v568_v30 = vadd.f32 %v567_v29, %v564_v28 }
 0x32a   : > { %570 = vst.msk [vmem:[#allocation3] sm:$0xff] %vm454_vm2, %v568_v30 }
 0x32b   : > { %v575_v33 = vpop.permute.xlu1 %574 }
 0x32c   : > { %v577_v34 = vmul.f32 %v575_v33, %v571_v32 }
 0x331   : > { %v658_v31 = vld [vmem:[#allocation3] sm:$0xff] }
 0x332   : > { %661 = vperm.xlu1 %1014, %v658_v31  }
 0x36c   : > { %v647_v35 = vpop.f32.mrb[0].mxu1 }
 0x36d   : > { %v651_v36 = vadd.f32 %v647_v35, %v577_v34  ;;  %v915_v37 = vpop.f32.mrb[1].mxu1 }
 0x36f   : > { %652 = vst.msk [vmem:[#allocation4] sm:$0xff] %vm457_vm0, %v651_v36 }
 0x376   : > { %v657_v40 = vld [vmem:[#allocation4] sm:$0xff] }
 0x3b1   : > { %v662_v38 = vpop.permute.xlu1 %661 }
 0x3b2   : > { %1019 = vrcp.f32 %v662_v38 }
 0x3bc   : > { %v1020_v39 = vpop.eup %1019 }
 0x3bd   : > { %v665_v41 = vmul.f32 %v1020_v39, %v657_v40 }
 0x3bf   : > { %666 = vst.msk [vmem:[%s437_s13] sm:$0xff] %vm457_vm0, %v665_v41 }
 0x3c0   : > { %1154 = shalt.err (!%p1151_p0)
}
 0x3c1   : > { %s1155_s24 = scalar_lea.hbm %s1571_s20, 128  ;;  %s1159_s16 = scalar_lea.hbm %s1631_s5, 1024 }
 0x3c2   : > { %p1156_p3 = scmp.ne.s32.totalorder %s1571_s20, %s1155_s24  ;;  %p1160_p10 = scmp.lt.u32.totalorder %s1571_s20, %s1631_s5 }
 0x3c3   : > { %p1161_p4 = scmp.lt.u32.totalorder %s1159_s16, %s1155_s24  ;;  %p1163_p8 = scmp.lt.u32.totalorder %s1155_s24, %s1571_s20 }
 0x3c4   : > { %p1157_p1 = pnand %p1156_p3, %p1669_p9 }
 0x3c5   : > { %p1162_p7 = por %p1161_p4, %p1160_p10 }
 0x3c6   : > { %p1158_p2 = pneg %p1157_p1 }
 0x3c7   : > { %p1164_p11 = por %p1163_p8, %p1162_p7 }
 0x3c9   : > { %p1165_p13 = pnand %p1164_p11, %p1158_p2 }
 0x3cb   : > { %1168 = shalt.err (!%p1165_p13)
}
 0x3cc   : > { %924 = dma.vmem_to_hbm [thread:$0]  (%p1669_p9), %s1573_s15, 128, %s1571_s20, %s668_s22  }
 0x3cd PF: > { %s1670_s26 = sld [smem:[#allocation22_spill]]  ;;  %s1671_s8 = sld [smem:[#allocation18_spill]] }
 0x3ce   : > { %s1672_s7 = sld [smem:[#allocation25_spill]] }
 0x3d3   : > { %p944_p12 = scmp.ge.s32.totalorder %s1670_s26, 2  ;;  %s696_s1 = sand.u32 1, %s1671_s8  }
 0x3d4   : > { %p1673_p6 = scmp.ne.s32.totalorder %s1672_s7, 0  ;;  %s697_s28 = scalar_lea.sflag [#allocation7], %s696_s1 }
 0x3d6   : > { %p940_p5 = pnand %p944_p12, %p1673_p6 }
 0x3d8   : > { %1214 = dma.done.wait (!%p940_p5), %s697_s28, 128  }
 0x3d9   : > { %1216 = vsyncadd (!%p940_p5), %s697_s28, 4294967168  ;;  %s27_s25 = sadd.s32 1, %s1670_s26   ;;  %s1674_s23 = sld [smem:[#allocation19_spill]] }
 0x3da   : > { %p24_p0 = scmp.ge.s32.totalorder %s27_s25, 10   ;;  %s1675_s20 = sld [smem:[#allocation26_spill]] }
 0x3db   : > { %s1676_s21 = sld [smem:[#allocation20_spill]]  ;;  %s1677_s22 = sld [smem:[#allocation21_spill]] }
 0x3dc   : > { %s1678_s9 = sld [smem:[#allocation23_spill]]  ;;  %s1679_s24 = sld [smem:[#allocation24_spill]] }
 0x3dd   : > { %s1680_s18 = smov %s1223_s19  ;;  %26 = sbr.rel (!%p24_p0) target bundleno = 13 (0xd), region = 133 }
 0x3df   : > { %s1681_s19 = smov %s1674_s23 }
 0x3e2   : > { %s1682_s23 = smov %s1678_s9 }
 0x3e4   :  { %702 = vsyncpa [#allocation6], 1 }
 0x3e5   :  { %704 = vsyncpa [#allocation6 + $0x1], 1 }
 0x3e6   :  { %705 = vsyncpa [#allocation9], 1 }
 0x3e7   :  { %707 = vsyncpa [#allocation9 + $0x1], 1 }
 0x3e8   :  { %708 = vsyncpa [#allocation12], 1 }
 0x3e9   :  { %710 = vsyncpa [#allocation12 + $0x1], 1 }
 0x3ea   :  { %711 = vsyncpa [#allocation7], 1 }
 0x3eb   :  { %713 = vsyncpa [#allocation7 + $0x1], 1 }

</bundles_post_ra>
